<compile_context>
chip_gen: v7x
topology: tpu7x:2x2x1
jax: 0.10.0
libtpu: 0.0.40
codegen_flags: <defaults>
</compile_context>

<pallas_src>
import functools

import numpy as np
import jax
import jax.numpy as jnp
from jax.experimental import pallas as pl
from jax.experimental.pallas import tpu as pltpu


# ----------------------------- helpers -----------------------------

def _round_up(v, m):
    return ((v + m - 1) // m) * m


def _padded_bytes(rows, lanes, itemsize):
    """Physical VMEM footprint of a (rows, lanes) tile of the given dtype."""
    subl = max(8, 32 // max(1, itemsize))          # 8 for f32, 16 for bf16, ...
    return _round_up(max(1, rows), subl) * _round_up(max(1, lanes), 128) * itemsize


def _vmem_limit_bytes():
    cap = None
    try:
        info = pltpu.get_tpu_info()
        for name in ("vmem_capacity_bytes", "vmem_size_bytes", "vmem_bytes"):
            v = getattr(info, name, None)
            if isinstance(v, (int, np.integer)) and int(v) > 0:
                cap = int(v)
                break
    except Exception:
        cap = None
    if cap is None:
        cap = 64 << 20                             # conservative: v7x physical VMEM
    return min((cap * 3) // 4, 100 << 20)


def _choose_tb(BC, H, W, Hp, in_itemsize, c_itemsize, vmem_limit):
    """How many planes (TB) to pack on the lane axis per grid step."""
    budget = (vmem_limit * 3) // 5

    def footprint(d):
        lanes = d * W
        blocks = 4 * _padded_bytes(H, lanes, in_itemsize)   # in + out, double-buffered
        scratch = _padded_bytes(Hp, lanes, c_itemsize)      # row-padded scratch
        live = 6 * _padded_bytes(H, lanes, 4)               # live temporaries headroom
        cols = 2 * _padded_bytes(1, lanes, 4)
        return blocks + scratch + live + cols

    # Blocks must be whole planes; multi-block requires a 128-lane multiple.
    cands = [d for d in range(1, BC + 1)
             if BC % d == 0 and (d == BC or (d * W) % 128 == 0)]
    fitting = [d for d in cands if footprint(d) <= budget]
    pool = fitting if fitting else [min(cands)]
    even = [d for d in pool if (BC // d) % 2 == 0]          # v7x: 2 TCs want even grid
    multi = [d for d in pool if (BC // d) >= 2]
    if even:
        tb = max(even)
    elif multi:
        tb = max(multi)
    else:
        tb = max(pool)
    return tb, BC // tb


# ----------------------------- Pallas kernel -----------------------------

def _opening_kernel(col_ref, img_ref, out_ref, row_ref, *,
                    H, W, kh, kw, oh, ow, neigh, neigh_flip,
                    pad_ero, pad_dil, flat, cdtype):
    """Fused opening of planes packed on the lane axis.

    col_ref : VMEM (1, LBW) int32   per-plane column index of every lane
    img_ref : VMEM (H, LBW)         input planes (packed on lanes)
    out_ref : VMEM (H, LBW)         opened planes
    row_ref : VMEM (Hp, LBW) cdtype scratch, padded only in the row direction
    """
    LBW = img_ref.shape[-1]
    Hp = H + kh - 1
    x = img_ref[...].astype(cdtype)

    # Hoisted per-plane column ids + the kw column-validity masks.
    cols = jnp.broadcast_to(col_ref[...], (H, LBW))
    masks = {}
    for j in range(kw):
        dc = j - ow
        if dc > 0:
            masks[dc] = cols < (W - dc)
        elif dc < 0:
            masks[dc] = cols >= (-dc)

    def hshift(v, dc, pad):
        # result[.., l] = v[.., l + dc] within the same plane, else `pad`.
        if dc == 0:
            return v
        s = pltpu.roll(v, (-dc) % LBW, 1)
        return jnp.where(masks[dc], s, pad)

    def set_row_halo(pad):
        if oh > 0:
            row_ref[0:oh, :] = jnp.full((oh, LBW), pad, dtype=cdtype)
        if kh - 1 - oh > 0:
            row_ref[oh + H:Hp, :] = jnp.full((kh - 1 - oh, LBW), pad, dtype=cdtype)

    if flat:
        # ---- erosion: separable min (columns in vregs, rows via scratch) ----
        hmin = x
        for j in range(kw):
            dc = j - ow
            if dc != 0:
                hmin = jnp.minimum(hmin, hshift(x, dc, pad_ero))
        set_row_halo(pad_ero)
        row_ref[oh:oh + H, :] = hmin
        er = row_ref[0:H, :]
        for i in range(1, kh):
            er = jnp.minimum(er, row_ref[i:i + H, :])
        # ---- dilation: separable max ----
        hmax = er
        for j in range(kw):
            dc = j - ow
            if dc != 0:
                hmax = jnp.maximum(hmax, hshift(er, dc, pad_dil))
        set_row_halo(pad_dil)
        row_ref[oh:oh + H, :] = hmax
        res = row_ref[0:H, :]
        for i in range(1, kh):
            res = jnp.maximum(res, row_ref[i:i + H, :])
    else:
        # ---- erosion: min over window of (value - neigh[i,j]) ----
        set_row_halo(pad_ero)
        row_ref[oh:oh + H, :] = x
        er = None
        for i in range(kh):
            base = row_ref[i:i + H, :]
            for j in range(kw):
                dc = j - ow
                b = float(neigh[i][j])
                v = hshift(base, dc, pad_ero)
                if b != 0.0:
                    v = v - b
                er = v if er is None else jnp.minimum(er, v)
        # ---- dilation: max over window of (value + neigh_flip[i,j]) ----
        set_row_halo(pad_dil)
        row_ref[oh:oh + H, :] = er
        res = None
        for i in range(kh):
            base = row_ref[i:i + H, :]
            for j in range(kw):
                dc = j - ow
                b = float(neigh_flip[i][j])
                v = hshift(base, dc, pad_dil)
                if b != 0.0:
                    v = v + b
                res = v if res is None else jnp.maximum(res, v)

    out_ref[...] = res.astype(out_ref.dtype)


# ----------------------------- JAX wrapper -----------------------------

def opening_pallas(image, kernel, structuring_element=None, origin=None,
                   border_type="geodesic", border_value=0.0, max_val=10000.0,
                   engine="unfold"):
    """Equivalent of Opening.forward (unfold & convolution engines agree)."""
    B, C, H, W = image.shape
    k_np = np.asarray(jax.device_get(kernel), dtype=np.float32)
    kh, kw = k_np.shape
    if origin is None:
        origin = [kh // 2, kw // 2]
    oh, ow = int(origin[0]), int(origin[1])

    # Static (trace-time) neighborhood, exactly as in the torch code.
    if structuring_element is None:
        neigh_np = np.zeros_like(k_np)
    else:
        neigh_np = np.asarray(jax.device_get(structuring_element),
                              dtype=np.float32).copy()
    neigh_np[k_np == 0] = -float(max_val)
    flat = bool(np.all(neigh_np == 0.0))
    neigh = tuple(map(tuple, neigh_np.tolist()))
    neigh_flip = tuple(map(tuple, neigh_np[::-1, ::-1].tolist()))

    if border_type == "geodesic":
        pad_ero, pad_dil = float(max_val), -float(max_val)
    elif border_type == "constant":
        pad_ero = pad_dil = float(border_value)
    else:
        raise NotImplementedError(f"border_type {border_type!r} not supported")

    BC = B * C
    Hp = H + kh - 1
    Wtot = BC * W
    cdtype = (image.dtype if (flat and jnp.issubdtype(image.dtype, jnp.floating))
              else jnp.float32)

    vmem_limit = _vmem_limit_bytes()
    TB, n_blocks = _choose_tb(BC, H, W, Hp, image.dtype.itemsize,
                              jnp.dtype(cdtype).itemsize, vmem_limit)
    if n_blocks == 1:
        LBW = _round_up(Wtot, 128)        # pad lanes so rolls/stores stay dense
    else:
        LBW = TB * W                      # guaranteed multiple of 128
    total = LBW * n_blocks

    # Per-lane, per-plane column ids (pad lanes get col=W so they never leak).
    col_np = np.tile(np.arange(W, dtype=np.int32), TB)
    if LBW > TB * W:
        col_np = np.concatenate([col_np,
                                 np.full(LBW - TB * W, W, dtype=np.int32)])
    col_ids = jnp.asarray(col_np[None, :])

    kern = functools.partial(
        _opening_kernel, H=H, W=W, kh=kh, kw=kw, oh=oh, ow=ow,
        neigh=neigh, neigh_flip=neigh_flip,
        pad_ero=pad_ero, pad_dil=pad_dil, flat=flat, cdtype=cdtype)

    taps = (kh + kw) if flat else (kh * kw)
    cost = pl.CostEstimate(
        flops=int(2 * taps * BC * H * W),
        transcendentals=0,
        bytes_accessed=int(2 * BC * H * W * image.dtype.itemsize))

    pallas_fn = pl.pallas_call(
        kern,
        out_shape=jax.ShapeDtypeStruct((H, total), image.dtype),
        grid_spec=pltpu.PrefetchScalarGridSpec(
            num_scalar_prefetch=0,
            grid=(n_blocks,),
            in_specs=[pl.BlockSpec((1, LBW), lambda i: (0, 0)),
                      pl.BlockSpec((H, LBW), lambda i: (0, i))],
            out_specs=pl.BlockSpec((H, LBW), lambda i: (0, i)),
            scratch_shapes=[pltpu.VMEM((Hp, LBW), cdtype)],
        ),
        compiler_params=pltpu.CompilerParams(
            dimension_semantics=("parallel",),
            vmem_limit_bytes=int(vmem_limit)),
        cost_estimate=cost,
    )

    def _run(img, cols):
        # Lane-dense packing: (B,C,H,W) -> (H, BC*W), planes side by side on lanes.
        x2 = jnp.transpose(img.reshape(BC, H, W), (1, 0, 2)).reshape(H, Wtot)
        if total > Wtot:
            x2 = jnp.pad(x2, ((0, 0), (0, total - Wtot)))
        o2 = pallas_fn(cols, x2)
        o2 = o2[:, :Wtot].reshape(H, BC, W)
        return jnp.transpose(o2, (1, 0, 2)).reshape(B, C, H, W)

    return jax.jit(_run)(image, col_ids)


class Opening:
    """Drop-in style wrapper mirroring the PyTorch module's constructor."""

    def __init__(self, kernel, structuring_element=None, origin=None,
                 border_type="geodesic", border_value=0.0, max_val=10000.0,
                 engine="unfold"):
        self.kernel = kernel
        self.structuring_element = structuring_element
        self.origin = origin
        self.border_type = border_type
        self.border_value = border_value
        self.max_val = max_val
        self.engine = engine

    def __call__(self, image):
        return opening_pallas(image, self.kernel, self.structuring_element,
                              self.origin, self.border_type, self.border_value,
                              self.max_val, self.engine)


# ----------------------------- pure-JAX reference -----------------------------

def _ref_morph(image, neigh_np, max_val, is_dilation, oh, ow):
    B, C, H, W = image.shape
    kh, kw = neigh_np.shape
    pad_val = -max_val if is_dilation else max_val
    padded = jnp.pad(image,
                     ((0, 0), (0, 0), (oh, kh - oh - 1), (ow, kw - ow - 1)),
                     mode="constant", constant_values=pad_val)
    n = neigh_np[::-1, ::-1] if is_dilation else neigh_np
    vals = []
    for i in range(kh):
        for j in range(kw):
            w = padded[:, :, i:i + H, j:j + W]
            vals.append(w + float(n[i, j]) if is_dilation else w - float(n[i, j]))
    stk = jnp.stack(vals, axis=0)
    return jnp.max(stk, axis=0) if is_dilation else jnp.min(stk, axis=0)


def opening_ref(image, kernel, structuring_element=None, max_val=10000.0):
    k_np = np.asarray(kernel, dtype=np.float32)
    kh, kw = k_np.shape
    if structuring_element is None:
        neigh_np = np.zeros_like(k_np)
    else:
        neigh_np = np.asarray(structuring_element, dtype=np.float32).copy()
    neigh_np[k_np == 0] = -float(max_val)
    oh, ow = kh // 2, kw // 2
    er = _ref_morph(image, neigh_np, max_val, False, oh, ow)
    return _ref_morph(er, neigh_np, max_val, True, oh, ow)


# ----------------------------- main -----------------------------

if __name__ == "__main__":
    key = jax.random.PRNGKey(0)
    B, C, H, W = 2, 4, 16, 16
    image = jax.random.uniform(key, (B, C, H, W), dtype=jnp.float32)

    # Flat 3x3 structuring element (fast separable path).
    kernel = jnp.ones((3, 3), dtype=jnp.float32)
    out = jax.block_until_ready(opening_pallas(image, kernel))
    ref = opening_ref(image, kernel)
    assert out.shape == image.shape and out.dtype == image.dtype
    assert jnp.allclose(out, ref, atol=1e-5), "flat-SE mismatch vs. reference"

    # Non-flat structuring element (general statically-baked-bias path).
    mask = jnp.array([[0.0, 1.0, 0.0],
                      [1.0, 1.0, 1.0],
                      [0.0, 1.0, 0.0]], dtype=jnp.float32)
    se = jnp.array([[0.0, 0.1, 0.0],
                    [0.1, 0.3, 0.1],
                    [0.0, 0.1, 0.0]], dtype=jnp.float32)
    out2 = jax.block_until_ready(
        opening_pallas(image, mask, structuring_element=se))
    ref2 = opening_ref(image, mask, structuring_element=se)
    assert jnp.allclose(out2, ref2, atol=1e-4), "non-flat-SE mismatch vs. reference"

    print("KERNEL_OK")
</pallas_src>

<mosaic_0001>
module attributes {stable_mosaic.version = 11 : i64} {
  func.func @_opening_kernel(%arg0: i32, %arg1: memref<1x128xi32, #tpu.memory_space<vmem>>, %arg2: memref<16x128xf32, #tpu.memory_space<vmem>>, %arg3: memref<16x128xf32, #tpu.memory_space<vmem>>, %arg4: memref<18x128xf32, #tpu.memory_space<vmem>>) attributes {dimension_semantics = [#tpu.dimension_semantics<parallel>], iteration_bounds = array<i64: 1>, scalar_prefetch = 0 : i64, scratch_operands = 1 : i64, tpu.core_type = #tpu.core_type<tc>, window_params = [{pipeline_mode = #tpu.pipeline_mode<synchronous>, transform_indices = @transform_0, window_bounds = array<i64: 1, 128>}, {transform_indices = @transform_1, window_bounds = array<i64: 16, 128>}, {transform_indices = @transform_2, window_bounds = array<i64: 16, 128>}]} {
    %c0 = arith.constant 0 : index
    %c0_0 = arith.constant 0 : index
    %0 = vector.load %arg2[%c0, %c0_0] : memref<16x128xf32, #tpu.memory_space<vmem>>, vector<16x128xf32>
    %c0_1 = arith.constant 0 : index
    %c0_2 = arith.constant 0 : index
    %1 = vector.load %arg1[%c0_1, %c0_2] : memref<1x128xi32, #tpu.memory_space<vmem>>, vector<1x128xi32>
    %2 = vector.shape_cast %1 : vector<1x128xi32> to vector<1x128xi32>
    %3 = vector.broadcast %2 : vector<1x128xi32> to vector<16x128xi32>
    %c1_i32 = arith.constant 1 : i32
    %4 = vector.broadcast %c1_i32 : i32 to vector<16x128xi32>
    %5 = arith.cmpi sge, %3, %4 : vector<16x128xi32>
    %c15_i32 = arith.constant 15 : i32
    %6 = vector.broadcast %c15_i32 : i32 to vector<16x128xi32>
    %7 = arith.cmpi slt, %3, %6 : vector<16x128xi32>
    %c1_i32_3 = arith.constant 1 : i32
    %8 = tpu.dynamic_rotate %0 by %c1_i32_3 dim 1 : vector<16x128xf32>, i32 -> vector<16x128xf32>
    %cst = arith.constant 1.000000e+04 : f32
    %9 = vector.broadcast %cst : f32 to vector<16x128xf32>
    %10 = arith.select %5, %8, %9 : vector<16x128xi1>, vector<16x128xf32>
    %11 = arith.minimumf %0, %10 : vector<16x128xf32>
    %c127_i32 = arith.constant 127 : i32
    %12 = tpu.dynamic_rotate %0 by %c127_i32 dim 1 : vector<16x128xf32>, i32 -> vector<16x128xf32>
    %cst_4 = arith.constant 1.000000e+04 : f32
    %13 = vector.broadcast %cst_4 : f32 to vector<16x128xf32>
    %14 = arith.select %7, %12, %13 : vector<16x128xi1>, vector<16x128xf32>
    %15 = arith.minimumf %11, %14 : vector<16x128xf32>
    %cst_5 = arith.constant 1.000000e+04 : f32
    %16 = vector.broadcast %cst_5 : f32 to vector<1x128xf32>
    %c0_6 = arith.constant 0 : index
    %c0_7 = arith.constant 0 : index
    %17 = vector.load %arg4[%c0_6, %c0_7] : memref<18x128xf32, #tpu.memory_space<vmem>>, vector<1x128xf32>
    tpu.vector_store %arg4[%c0_6, %c0_7], %16 {strides = array<i32>} : memref<18x128xf32, #tpu.memory_space<vmem>>, vector<1x128xf32>,
    %cst_8 = arith.constant 1.000000e+04 : f32
    %18 = vector.broadcast %cst_8 : f32 to vector<1x128xf32>
    %c17 = arith.constant 17 : index
    %c0_9 = arith.constant 0 : index
    %19 = vector.load %arg4[%c17, %c0_9] : memref<18x128xf32, #tpu.memory_space<vmem>>, vector<1x128xf32>
    tpu.vector_store %arg4[%c17, %c0_9], %18 {strides = array<i32>} : memref<18x128xf32, #tpu.memory_space<vmem>>, vector<1x128xf32>,
    %c1 = arith.constant 1 : index
    %c0_10 = arith.constant 0 : index
    %20 = vector.load %arg4[%c1, %c0_10] : memref<18x128xf32, #tpu.memory_space<vmem>>, vector<16x128xf32>
    tpu.vector_store %arg4[%c1, %c0_10], %15 {strides = array<i32>} : memref<18x128xf32, #tpu.memory_space<vmem>>, vector<16x128xf32>,
    %c0_11 = arith.constant 0 : index
    %c0_12 = arith.constant 0 : index
    %21 = vector.load %arg4[%c0_11, %c0_12] : memref<18x128xf32, #tpu.memory_space<vmem>>, vector<16x128xf32>
    %c1_13 = arith.constant 1 : index
    %c0_14 = arith.constant 0 : index
    %22 = vector.load %arg4[%c1_13, %c0_14] : memref<18x128xf32, #tpu.memory_space<vmem>>, vector<16x128xf32>
    %23 = arith.minimumf %21, %22 : vector<16x128xf32>
    %c2 = arith.constant 2 : index
    %c0_15 = arith.constant 0 : index
    %24 = vector.load %arg4[%c2, %c0_15] : memref<18x128xf32, #tpu.memory_space<vmem>>, vector<16x128xf32>
    %25 = arith.minimumf %23, %24 : vector<16x128xf32>
    %c1_i32_16 = arith.constant 1 : i32
    %26 = tpu.dynamic_rotate %25 by %c1_i32_16 dim 1 : vector<16x128xf32>, i32 -> vector<16x128xf32>
    %cst_17 = arith.constant -1.000000e+04 : f32
    %27 = vector.broadcast %cst_17 : f32 to vector<16x128xf32>
    %28 = arith.select %5, %26, %27 : vector<16x128xi1>, vector<16x128xf32>
    %29 = arith.maximumf %25, %28 : vector<16x128xf32>
    %c127_i32_18 = arith.constant 127 : i32
    %30 = tpu.dynamic_rotate %25 by %c127_i32_18 dim 1 : vector<16x128xf32>, i32 -> vector<16x128xf32>
    %cst_19 = arith.constant -1.000000e+04 : f32
    %31 = vector.broadcast %cst_19 : f32 to vector<16x128xf32>
    %32 = arith.select %7, %30, %31 : vector<16x128xi1>, vector<16x128xf32>
    %33 = arith.maximumf %29, %32 : vector<16x128xf32>
    %cst_20 = arith.constant -1.000000e+04 : f32
    %34 = vector.broadcast %cst_20 : f32 to vector<1x128xf32>
    %c0_21 = arith.constant 0 : index
    %c0_22 = arith.constant 0 : index
    %35 = vector.load %arg4[%c0_21, %c0_22] : memref<18x128xf32, #tpu.memory_space<vmem>>, vector<1x128xf32>
    tpu.vector_store %arg4[%c0_21, %c0_22], %34 {strides = array<i32>} : memref<18x128xf32, #tpu.memory_space<vmem>>, vector<1x128xf32>,
    %cst_23 = arith.constant -1.000000e+04 : f32
    %36 = vector.broadcast %cst_23 : f32 to vector<1x128xf32>
    %c17_24 = arith.constant 17 : index
    %c0_25 = arith.constant 0 : index
    %37 = vector.load %arg4[%c17_24, %c0_25] : memref<18x128xf32, #tpu.memory_space<vmem>>, vector<1x128xf32>
    tpu.vector_store %arg4[%c17_24, %c0_25], %36 {strides = array<i32>} : memref<18x128xf32, #tpu.memory_space<vmem>>, vector<1x128xf32>,
    %c1_26 = arith.constant 1 : index
    %c0_27 = arith.constant 0 : index
    %38 = vector.load %arg4[%c1_26, %c0_27] : memref<18x128xf32, #tpu.memory_space<vmem>>, vector<16x128xf32>
    tpu.vector_store %arg4[%c1_26, %c0_27], %33 {strides = array<i32>} : memref<18x128xf32, #tpu.memory_space<vmem>>, vector<16x128xf32>,
    %c0_28 = arith.constant 0 : index
    %c0_29 = arith.constant 0 : index
    %39 = vector.load %arg4[%c0_28, %c0_29] : memref<18x128xf32, #tpu.memory_space<vmem>>, vector<16x128xf32>
    %c1_30 = arith.constant 1 : index
    %c0_31 = arith.constant 0 : index
    %40 = vector.load %arg4[%c1_30, %c0_31] : memref<18x128xf32, #tpu.memory_space<vmem>>, vector<16x128xf32>
    %41 = arith.maximumf %39, %40 : vector<16x128xf32>
    %c2_32 = arith.constant 2 : index
    %c0_33 = arith.constant 0 : index
    %42 = vector.load %arg4[%c2_32, %c0_33] : memref<18x128xf32, #tpu.memory_space<vmem>>, vector<16x128xf32>
    %43 = arith.maximumf %41, %42 : vector<16x128xf32>
    %c0_34 = arith.constant 0 : index
    %c0_35 = arith.constant 0 : index
    %44 = vector.load %arg3[%c0_34, %c0_35] : memref<16x128xf32, #tpu.memory_space<vmem>>, vector<16x128xf32>
    tpu.vector_store %arg3[%c0_34, %c0_35], %43 {strides = array<i32>} : memref<16x128xf32, #tpu.memory_space<vmem>>, vector<16x128xf32>,
    return
  }
  func.func @transform_0(%arg0: i32) -> (i32, i32) {
    %c0_i32 = arith.constant 0 : i32
    %c0_i32_0 = arith.constant 0 : i32
    %c0_i32_1 = arith.constant 0 : i32
    return %c0_i32, %c0_i32_0 : i32, i32
  }
  func.func @transform_1(%arg0: i32) -> (i32, i32) {
    %c0_i32 = arith.constant 0 : i32
    %c0_i32_0 = arith.constant 0 : i32
    return %c0_i32, %arg0 : i32, i32
  }
  func.func @transform_2(%arg0: i32) -> (i32, i32) {
    %c0_i32 = arith.constant 0 : i32
    %c0_i32_0 = arith.constant 0 : i32
    return %c0_i32, %arg0 : i32, i32
  }
}

</mosaic_0001>

<bundles_post_ra>
// kernel: _run.1
= control target key start
LH: loop header
LB: loop body
LE: loop exit
PB: predicated region body
PF: predicated region fallthrough
CT: control target
= control target key end

     0   :  { %v91_v1 = vmov 10000.0   ;;  %s92_s11 = smov 1   ;;  %s93_s12 = smov 127   ;;  %v94_v17 = vmov -10000.0   ;;  %s141_s1 = inlined_call_operand.vmem [shape: f32[16,128], index: 1, kind: input, shape index: {}]   ;;  %s142_s0 = inlined_call_operand.vmem [shape: s32[1,128], index: 0, kind: input, shape index: {}]   ;;  %s143_s2 = inlined_call_operand.vmem [shape: f32[16,128], index: 2, kind: output, shape index: {}]  }
   0x1   :  { %v11_v0 = vld [vmem:[%s141_s1] sm:$0xff]  ;;  %36 = vst [vmem:[#allocation2] sm:$0x1] %v91_v1  ;;  %37 = vst [vmem:[#allocation2 + $0x11] sm:$0x1] %v91_v1  ;;  %v12_v2 = vld [vmem:[%s141_s1 + $0x8] sm:$0xff] }
   0x2   :  { %20 = vrot.lane.b32.xlu0 %v11_v0, %s92_s11  ;;  %28 = vrot.lane.b32.xlu1 %v11_v0, %s93_s12  ;;  %v86_v3 = vld [vmem:[%s142_s0] ss:$0 sm:$0xff] }
   0x3   :  { %vm18_vm0 = vcmp.ge.s32.totalorder %v86_v3, 1  ;;  %vm19_vm1 = vcmp.lt.s32.totalorder %v86_v3, 15 }
   0x6   :  { %22 = vrot.lane.b32.xlu0 %v12_v2, %s92_s11  ;;  %30 = vrot.lane.b32.xlu1 %v12_v2, %s93_s12 }
  0x74   :  { %v21_v4 = vpop.permute.xlu0 %20  ;;  %v29_v5 = vpop.permute.xlu1 %28 }
  0x75   :  { %v24_v6 = vsel %vm18_vm0, %v21_v4, 10000.0  ;;  %v32_v7 = vsel %vm19_vm1, %v29_v5, 10000.0 }
  0x76   :  { %v26_v8 = vmin.f32 %v11_v0, %v24_v6 }
  0x78   :  { %v34_v9 = vmin.f32 %v26_v8, %v32_v7  ;;  %v23_v10 = vpop.permute.xlu0 %22  ;;  %v31_v11 = vpop.permute.xlu1 %30 }
  0x79   :  { %v25_v12 = vsel %vm18_vm0, %v23_v10, 10000.0  ;;  %v33_v13 = vsel %vm19_vm1, %v31_v11, 10000.0 }
  0x7a   :  { %38 = vst [vmem:[#allocation2 + $0x1] sm:$0xff] %v34_v9  ;;  %v27_v14 = vmin.f32 %v12_v2, %v25_v12 }
  0x7c   :  { %v35_v15 = vmin.f32 %v27_v14, %v33_v13 }
  0x7e   :  { %39 = vst [vmem:[#allocation2 + $0x9] sm:$0xff] %v35_v15 }
  0x81   :  { %v40_v16 = vld [vmem:[#allocation2] sm:$0xff] }
  0x82   :  { %66 = vst [vmem:[#allocation2] sm:$0x1] %v94_v17  ;;  %v44_v18 = vmin.f32 %v40_v16, %v34_v9 }
  0x85   :  { %v46_v19 = vld [vmem:[#allocation2 + $0x2] sm:$0xff]  ;;  %v47_v21 = vld [vmem:[#allocation2 + $0xa] sm:$0xff] }
  0x86   :  { %v41_v20 = vld [vmem:[#allocation2 + $0x8] sm:$0xff]  ;;  %v48_v22 = vmin.f32 %v44_v18, %v46_v19  ;;  %67 = vst [vmem:[#allocation2 + $0x11] sm:$0x1] %v94_v17 }
  0x87   :  { %v45_v23 = vmin.f32 %v41_v20, %v35_v15 }
  0x88   :  { %50 = vrot.lane.b32.xlu0 %v48_v22, %s92_s11 }
  0x89   :  { %v49_v24 = vmin.f32 %v45_v23, %v47_v21 }
  0x8b   :  { %52 = vrot.lane.b32.xlu1 %v49_v24, %s92_s11 }
  0x8c   :  { %58 = vrot.lane.b32.xlu0 %v48_v22, %s93_s12 }
  0x8f   :  { %60 = vrot.lane.b32.xlu1 %v49_v24, %s93_s12 }
  0xfa   :  { %v51_v25 = vpop.permute.xlu0 %50 }
  0xfb   :  { %v54_v26 = vsel %vm18_vm0, %v51_v25, -10000.0 }
  0xfc   :  { %v56_v29 = vmax.f32 %v48_v22, %v54_v26 }
  0xfd   :  { %v53_v27 = vpop.permute.xlu1 %52 }
  0xfe   :  { %v55_v28 = vsel %vm18_vm0, %v53_v27, -10000.0  ;;  %v59_v30 = vpop.permute.xlu0 %58 }
  0xff   :  { %v62_v31 = vsel %vm19_vm1, %v59_v30, -10000.0  ;;  %v57_v32 = vmax.f32 %v49_v24, %v55_v28 }
 0x100   :  { %v64_v33 = vmax.f32 %v56_v29, %v62_v31 }
 0x101   :  { %v61_v34 = vpop.permute.xlu1 %60 }
 0x102   :  { %v63_v35 = vsel %vm19_vm1, %v61_v34, -10000.0  ;;  %68 = vst [vmem:[#allocation2 + $0x1] sm:$0xff] %v64_v33 }
 0x103   :  { %v65_v36 = vmax.f32 %v57_v32, %v63_v35 }
 0x105   :  { %69 = vst [vmem:[#allocation2 + $0x9] sm:$0xff] %v65_v36 }
 0x109   :  { %v70_v37 = vld [vmem:[#allocation2] sm:$0xff] }
 0x10a   :  { %v74_v38 = vmax.f32 %v70_v37, %v64_v33 }
 0x10c   :  { %v71_v39 = vld [vmem:[#allocation2 + $0x8] sm:$0xff] }
 0x10d   :  { %v76_v40 = vld [vmem:[#allocation2 + $0x2] sm:$0xff]  ;;  %v75_v41 = vmax.f32 %v71_v39, %v65_v36  ;;  %v77_v43 = vld [vmem:[#allocation2 + $0xa] sm:$0xff] }
 0x10e   :  { %v78_v42 = vmax.f32 %v74_v38, %v76_v40 }
 0x10f   :  { %v79_v44 = vmax.f32 %v75_v41, %v77_v43 }
 0x110   :  { %80 = vst [vmem:[%s143_s2] sm:$0xff] %v78_v42 }
 0x111   :  { %81 = vst [vmem:[%s143_s2 + $0x8] sm:$0xff] %v79_v44 }

</bundles_post_ra>
